<compile_context>
chip_gen: v5e
topology: v5e:2x2
jax: 0.10.0
libtpu: 0.0.40
codegen_flags: <defaults>
</compile_context>

<pallas_src>
import functools

import jax
import jax.numpy as jnp
from jax.experimental import pallas as pl
from jax.experimental.pallas import tpu as pltpu


def _fmm_kernel(gam_ref,                    # SMEM (4,): gamma_rgb, gamma_th, gamma_2_rgb, gamma_2_th
                x_ref, xth_ref,             # VMEM (1, C, Npad)
                w_rgb_ref, w_th_ref,        # VMEM (2C, C)  [K weights stacked on V weights]
                bias_ref,                   # VMEM (2C, 2)  [col 0 = rgb bias, col 1 = th bias]
                out_rgb_ref, out_th_ref,    # VMEM (1, C, Npad)
                k_ref,                      # scratch (2C, Npad) f32: [x_k ; x_th_k]
                v_ref,                      # scratch (2C, Npad) f32: [x_v ; x_v_th]
                acc_ref,                    # scratch (2C, Npad) f32: stacked P@V accumulator
                *, c, n_valid, n_pad, tile_n):
    t = pl.program_id(1)
    n_tiles = pl.num_programs(1)

    # ---- tile step 0: fused 1x1 convs + scratch layout + accumulator init ----
    @pl.when(t == 0)
    def _init():
        x = x_ref[0].astype(jnp.float32)                      # (C, Npad)
        xth = xth_ref[0].astype(jnp.float32)
        bias = bias_ref[...]                                  # (2C, 2)
        feat_rgb = (jnp.dot(w_rgb_ref[...], x, preferred_element_type=jnp.float32)
                    + bias[:, 0:1])                           # (2C, Npad) = [x_k ; x_v]
        feat_th = (jnp.dot(w_th_ref[...], xth, preferred_element_type=jnp.float32)
                   + bias[:, 1:2])                            # (2C, Npad) = [x_th_k ; x_v_th]
        if n_pad != n_valid:
            # zero padded pixel columns so they never contribute to any reduction
            col = jax.lax.broadcasted_iota(jnp.int32, (2 * c, n_pad), 1)
            valid = col < n_valid
            feat_rgb = jnp.where(valid, feat_rgb, 0.0)
            feat_th = jnp.where(valid, feat_th, 0.0)
        # Re-pack into K-major / V-major scratch so the inner loop does a single
        # fused P@V matmul for both streams.
        k_ref[pl.ds(0, c), :] = feat_rgb[:c]
        k_ref[pl.ds(c, c), :] = feat_th[:c]
        v_ref[pl.ds(0, c), :] = feat_rgb[c:]
        v_ref[pl.ds(c, c), :] = feat_th[c:]
        acc_ref[...] = jnp.zeros_like(acc_ref)

    # ---- position attention for this query-row tile (never forms the NxN) ----
    off = pl.multiple_of(t * tile_n, 128)
    q_tile = k_ref[pl.ds(c, c), pl.ds(off, tile_n)]           # x_th_k tile (C, tile_n)
    keys = k_ref[pl.ds(0, c), :]                              # x_k (C, Npad)

    s = jnp.dot(q_tile.T, keys, preferred_element_type=jnp.float32)   # (tile_n, Npad)
    if n_pad != n_valid:
        col = jax.lax.broadcasted_iota(jnp.int32, s.shape, 1)
        s = jnp.where(col < n_valid, s, -1e30)                # mask padded key columns
    s = s - jnp.max(s, axis=-1, keepdims=True)
    p = jnp.exp(s)
    p = p * pl.reciprocal(jnp.sum(p, axis=-1, keepdims=True), approx=True)
    p_b = p.astype(jnp.bfloat16)

    # acc[c', m] += sum_{n in tile} v[c', n] * P[n, m]  for both streams at once
    v_tile = v_ref[:, pl.ds(off, tile_n)]                     # (2C, tile_n)
    acc_ref[...] += jnp.dot(v_tile.astype(jnp.bfloat16), p_b,
                            preferred_element_type=jnp.float32)

    # ---- last tile step: channel attention + residual combine + writeback ----
    @pl.when(t == n_tiles - 1)
    def _finalize():
        g_rgb, g_th = gam_ref[0], gam_ref[1]
        g2_rgb, g2_th = gam_ref[2], gam_ref[3]
        x = x_ref[0].astype(jnp.float32)
        xth = xth_ref[0].astype(jnp.float32)
        x_v = v_ref[pl.ds(0, c), :]                           # (C, Npad) f32
        x_v_th = v_ref[pl.ds(c, c), :]

        x_1 = acc_ref[pl.ds(0, c), :] * g_rgb + x
        x_th_1 = acc_ref[pl.ds(c, c), :] * g_th + xth

        # channel attention: energy[i, j] = sum_n x_v_th[i, n] * x_v[j, n]
        energy = jnp.dot(x_v_th, x_v.T, preferred_element_type=jnp.float32)  # (C, C)
        # softmax(max(e) - e) == exp(min(e) - e) / sum  (one fewer reduce/sub)
        sim_c = jnp.exp(jnp.min(energy, axis=-1, keepdims=True) - energy)
        sim_c = sim_c * pl.reciprocal(jnp.sum(sim_c, axis=-1, keepdims=True),
                                      approx=True)

        x_2 = jnp.dot(sim_c, x_v, preferred_element_type=jnp.float32)        # (C, Npad)
        x_th_2 = jnp.dot(sim_c, x_v_th, preferred_element_type=jnp.float32)

        out_rgb_ref[0] = (g2_rgb * x_2 + x_1).astype(out_rgb_ref.dtype)
        out_th_ref[0] = (g2_th * x_th_2 + x_th_1).astype(out_th_ref.dtype)


def _pick_tile(n_pad):
    """Query-row tile size: small maps stay multi-step; large maps take the
    biggest 128-multiple dividing n_pad whose (tile_n, n_pad) f32 score/prob
    temporaries (~3 copies) stay under ~12 MiB of VMEM."""
    if n_pad <= 1024:
        return 128
    for cand in (1024, 512, 256, 128):
        if n_pad % cand == 0 and 3 * cand * n_pad * 4 <= 12 * 1024 * 1024:
            return cand
    return 128


def fmm_forward(x, x_th, params):
    """x, x_th: (b, c, w, h) float32 (NCHW).  Returns (x_2, x_th_2), same shape."""
    b, c, w, h = x.shape
    assert c % 8 == 0, "channel count must be a multiple of 8 for this kernel"
    n = w * h
    n_pad = ((n + 127) // 128) * 128

    tile_n = _pick_tile(n_pad)
    n_tiles = n_pad // tile_n

    x_f = x.reshape(b, c, n)
    xth_f = x_th.reshape(b, c, n)
    if n_pad != n:
        pad = ((0, 0), (0, 0), (0, n_pad - n))
        x_f = jnp.pad(x_f, pad)
        xth_f = jnp.pad(xth_f, pad)

    # Fuse the K and V 1x1 convs per stream: (2C, C) weights, biases packed (2C, 2).
    w_rgb = jnp.concatenate([params["wk_rgb"], params["wv_rgb"]], axis=0)
    w_th = jnp.concatenate([params["wk_th"], params["wv_th"]], axis=0)
    bias = jnp.concatenate(
        [jnp.concatenate([params["bk_rgb"], params["bv_rgb"]], axis=0),
         jnp.concatenate([params["bk_th"], params["bv_th"]], axis=0)],
        axis=1)                                                # (2C, 2)

    feat_spec = pl.BlockSpec((1, c, n_pad), lambda i, t: (i, 0, 0))
    weight_spec = pl.BlockSpec((2 * c, c), lambda i, t: (0, 0))
    bias_spec = pl.BlockSpec((2 * c, 2), lambda i, t: (0, 0))

    # Rough VMEM budget (bytes), used to size the scoped limit for large N.
    feat_bytes = c * n_pad * 4
    est = (8 * feat_bytes                 # x, xth, out_rgb, out_th (double-buffered)
           + 3 * (2 * c) * n_pad * 4      # k / v / acc scratch
           + 2 * (2 * c) * n_pad * 4      # init-time fused-conv temporaries
           + 3 * tile_n * n_pad * 4       # score / prob temporaries
           + 2 * (2 * c) * c * 4)         # weights
    vmem_limit = int(min(max(2 * est, 32 * 1024 * 1024), 64 * 1024 * 1024))

    kernel = functools.partial(_fmm_kernel, c=c, n_valid=n, n_pad=n_pad,
                               tile_n=tile_n)

    out_rgb, out_th = pl.pallas_call(
        kernel,
        out_shape=(jax.ShapeDtypeStruct((b, c, n_pad), x.dtype),
                   jax.ShapeDtypeStruct((b, c, n_pad), x.dtype)),
        grid=(b, n_tiles),
        in_specs=[
            pl.BlockSpec(memory_space=pltpu.MemorySpace.SMEM),  # gammas (4 scalars)
            feat_spec, feat_spec,                               # x, x_th (resident per batch)
            weight_spec, weight_spec,                           # fused conv weights
            bias_spec,                                          # packed biases
        ],
        out_specs=[feat_spec, feat_spec],
        scratch_shapes=[
            pltpu.VMEM((2 * c, n_pad), jnp.float32),            # k  = [x_k ; x_th_k]
            pltpu.VMEM((2 * c, n_pad), jnp.float32),            # v  = [x_v ; x_v_th]
            pltpu.VMEM((2 * c, n_pad), jnp.float32),            # stacked position acc
        ],
        compiler_params=pltpu.CompilerParams(
            dimension_semantics=("parallel", "arbitrary"),
            vmem_limit_bytes=vmem_limit),
    )(params["gammas"], x_f, xth_f, w_rgb, w_th, bias)

    out_rgb = out_rgb[:, :, :n].reshape(b, c, w, h)
    out_th = out_th[:, :, :n].reshape(b, c, w, h)
    return out_rgb, out_th


def fmm_reference(x, x_th, params):
    """Pure-JAX f32 reference mirroring the PyTorch forward, for validation."""
    b, c, w, h = x.shape
    n = w * h
    xr = x.reshape(b, c, n)
    xtr = x_th.reshape(b, c, n)

    def conv(wt, bs, inp):
        return jnp.einsum("oi,bin->bon", wt, inp) + bs.reshape(1, c, 1)

    x_k = conv(params["wk_rgb"], params["bk_rgb"], xr)
    x_th_k = conv(params["wk_th"], params["bk_th"], xtr)
    x_v = conv(params["wv_rgb"], params["bv_rgb"], xr)
    x_v_th = conv(params["wv_th"], params["bv_th"], xtr)

    g_rgb, g_th, g2_rgb, g2_th = params["gammas"]

    sim = jnp.einsum("bcn,bcm->bnm", x_th_k, x_k)
    sim = jax.nn.softmax(sim, axis=-1)
    x_1 = jnp.einsum("bcn,bnm->bcm", x_v, sim) * g_rgb + xr
    x_th_1 = jnp.einsum("bcn,bnm->bcm", x_v_th, sim) * g_th + xtr

    energy = jnp.einsum("bin,bjn->bij", x_v_th, x_v)
    sim_c = jnp.max(energy, axis=-1, keepdims=True) - energy
    sim_c = jax.nn.softmax(sim_c, axis=-1)
    x_2 = g2_rgb * jnp.einsum("bij,bjn->bin", sim_c, x_v) + x_1
    x_th_2 = g2_th * jnp.einsum("bij,bjn->bin", sim_c, x_v_th) + x_th_1

    return x_2.reshape(b, c, w, h), x_th_2.reshape(b, c, w, h)


def init_params(key, c):
    ks = jax.random.split(key, 8)
    scale = 1.0 / jnp.sqrt(c)
    return {
        "wk_rgb": jax.random.uniform(ks[0], (c, c), jnp.float32, -scale, scale),
        "bk_rgb": jax.random.uniform(ks[1], (c, 1), jnp.float32, -scale, scale),
        "wk_th":  jax.random.uniform(ks[2], (c, c), jnp.float32, -scale, scale),
        "bk_th":  jax.random.uniform(ks[3], (c, 1), jnp.float32, -scale, scale),
        "wv_rgb": jax.random.uniform(ks[4], (c, c), jnp.float32, -scale, scale),
        "bv_rgb": jax.random.uniform(ks[5], (c, 1), jnp.float32, -scale, scale),
        "wv_th":  jax.random.uniform(ks[6], (c, c), jnp.float32, -scale, scale),
        "bv_th":  jax.random.uniform(ks[7], (c, 1), jnp.float32, -scale, scale),
        # nn.Parameter(torch.zeros(1)) in the module; nonzero here so both
        # attention paths actually contribute to the checked output.
        "gammas": jnp.array([0.3, 0.7, 0.5, 0.9], jnp.float32),
    }


if __name__ == "__main__":
    key = jax.random.PRNGKey(0)
    b, c, w, h = 2, 8, 16, 16            # N = 256 -> 2 query tiles of 128
    kx, kxt, kp = jax.random.split(key, 3)
    x = jax.random.normal(kx, (b, c, w, h), jnp.float32)
    x_th = jax.random.normal(kxt, (b, c, w, h), jnp.float32)
    params = init_params(kp, c)

    out_rgb, out_th = fmm_forward(x, x_th, params)
    jax.block_until_ready((out_rgb, out_th))

    ref_rgb, ref_th = fmm_reference(x, x_th, params)
    assert out_rgb.shape == (b, c, w, h) and out_th.shape == (b, c, w, h)
    # bf16 P@V matmuls + approx reciprocals loosen the tolerance vs. pure f32.
    assert jnp.allclose(out_rgb, ref_rgb, atol=5e-2, rtol=5e-2), \
        float(jnp.max(jnp.abs(out_rgb - ref_rgb)))
    assert jnp.allclose(out_th, ref_th, atol=5e-2, rtol=5e-2), \
        float(jnp.max(jnp.abs(out_th - ref_th)))

    print("KERNEL_OK")
</pallas_src>

<mosaic_0001>
module attributes {stable_mosaic.version = 11 : i64} {
  func.func @_fmm_kernel(%arg0: i32, %arg1: i32, %arg2: memref<4xf32, #tpu.memory_space<smem>>, %arg3: memref<1x8x256xf32, #tpu.memory_space<vmem>>, %arg4: memref<1x8x256xf32, #tpu.memory_space<vmem>>, %arg5: memref<16x8xf32, #tpu.memory_space<vmem>>, %arg6: memref<16x8xf32, #tpu.memory_space<vmem>>, %arg7: memref<16x2xf32, #tpu.memory_space<vmem>>, %arg8: memref<1x8x256xf32, #tpu.memory_space<vmem>>, %arg9: memref<1x8x256xf32, #tpu.memory_space<vmem>>, %arg10: memref<16x256xf32, #tpu.memory_space<vmem>>, %arg11: memref<16x256xf32, #tpu.memory_space<vmem>>, %arg12: memref<16x256xf32, #tpu.memory_space<vmem>>) attributes {dimension_semantics = [#tpu.dimension_semantics<parallel>, #tpu.dimension_semantics<arbitrary>], iteration_bounds = array<i64: 2, 2>, scalar_prefetch = 0 : i64, scratch_operands = 3 : i64, tpu.core_type = #tpu.core_type<tc>, window_params = [{transform_indices = @transform_0, window_bounds = array<i64: 4>}, {transform_indices = @transform_1, window_bounds = array<i64: 1, 8, 256>}, {transform_indices = @transform_2, window_bounds = array<i64: 1, 8, 256>}, {pipeline_mode = #tpu.pipeline_mode<synchronous>, transform_indices = @transform_3, window_bounds = array<i64: 16, 8>}, {pipeline_mode = #tpu.pipeline_mode<synchronous>, transform_indices = @transform_4, window_bounds = array<i64: 16, 8>}, {pipeline_mode = #tpu.pipeline_mode<synchronous>, transform_indices = @transform_5, window_bounds = array<i64: 16, 2>}, {transform_indices = @transform_6, window_bounds = array<i64: 1, 8, 256>}, {transform_indices = @transform_7, window_bounds = array<i64: 1, 8, 256>}]} {
    %c0_i32 = arith.constant 0 : i32
    %0 = arith.cmpi eq, %arg1, %c0_i32 : i32
    %1 = arith.extui %0 : i1 to i32
    %c0_i32_0 = arith.constant 0 : i32
    %2 = arith.cmpi ne, %1, %c0_i32_0 : i32
    scf.if %2 {
      %c0_11 = arith.constant 0 : index
      %c0_12 = arith.constant 0 : index
      %c0_13 = arith.constant 0 : index
      %31 = vector.load %arg3[%c0_11, %c0_12, %c0_13] : memref<1x8x256xf32, #tpu.memory_space<vmem>>, vector<1x8x256xf32>
      %32 = vector.shape_cast %31 : vector<1x8x256xf32> to vector<8x256xf32>
      %c0_14 = arith.constant 0 : index
      %c0_15 = arith.constant 0 : index
      %c0_16 = arith.constant 0 : index
      %33 = vector.load %arg4[%c0_14, %c0_15, %c0_16] : memref<1x8x256xf32, #tpu.memory_space<vmem>>, vector<1x8x256xf32>
      %34 = vector.shape_cast %33 : vector<1x8x256xf32> to vector<8x256xf32>
      %c0_17 = arith.constant 0 : index
      %c0_18 = arith.constant 0 : index
      %35 = vector.load %arg7[%c0_17, %c0_18] : memref<16x2xf32, #tpu.memory_space<vmem>>, vector<16x2xf32>
      %c0_19 = arith.constant 0 : index
      %c0_20 = arith.constant 0 : index
      %36 = vector.load %arg5[%c0_19, %c0_20] : memref<16x8xf32, #tpu.memory_space<vmem>>, vector<16x8xf32>
      %cst_21 = arith.constant dense<0.000000e+00> : vector<16x256xf32>
      %37 = tpu.matmul %36, %32, %cst_21 {dimension_numbers = #tpu.dot_dimension_numbers<[1], [0], [0], [1], [0, 0, 1, 1], [], []>} : vector<16x8xf32>, vector<8x256xf32>, vector<16x256xf32> -> vector<16x256xf32>
      %38 = vector.extract_strided_slice %35 {offsets = [0, 0], sizes = [16, 1], strides = [1, 1]} : vector<16x2xf32> to vector<16x1xf32>
      %39 = vector.broadcast %38 : vector<16x1xf32> to vector<16x256xf32>
      %40 = arith.addf %37, %39 : vector<16x256xf32>
      %c0_22 = arith.constant 0 : index
      %c0_23 = arith.constant 0 : index
      %41 = vector.load %arg6[%c0_22, %c0_23] : memref<16x8xf32, #tpu.memory_space<vmem>>, vector<16x8xf32>
      %cst_24 = arith.constant dense<0.000000e+00> : vector<16x256xf32>
      %42 = tpu.matmul %41, %34, %cst_24 {dimension_numbers = #tpu.dot_dimension_numbers<[1], [0], [0], [1], [0, 0, 1, 1], [], []>} : vector<16x8xf32>, vector<8x256xf32>, vector<16x256xf32> -> vector<16x256xf32>
      %43 = vector.extract_strided_slice %35 {offsets = [0, 1], sizes = [16, 1], strides = [1, 1]} : vector<16x2xf32> to vector<16x1xf32>
      %44 = vector.broadcast %43 : vector<16x1xf32> to vector<16x256xf32>
      %45 = arith.addf %42, %44 : vector<16x256xf32>
      %46 = vector.extract_strided_slice %40 {offsets = [0, 0], sizes = [8, 256], strides = [1, 1]} : vector<16x256xf32> to vector<8x256xf32>
      %c0_25 = arith.constant 0 : index
      %c0_26 = arith.constant 0 : index
      %47 = vector.load %arg10[%c0_25, %c0_26] : memref<16x256xf32, #tpu.memory_space<vmem>>, vector<8x256xf32>
      tpu.vector_store %arg10[%c0_25, %c0_26], %46 {strides = array<i32>} : memref<16x256xf32, #tpu.memory_space<vmem>>, vector<8x256xf32>,
      %48 = vector.extract_strided_slice %45 {offsets = [0, 0], sizes = [8, 256], strides = [1, 1]} : vector<16x256xf32> to vector<8x256xf32>
      %c8_27 = arith.constant 8 : index
      %c0_28 = arith.constant 0 : index
      %49 = vector.load %arg10[%c8_27, %c0_28] : memref<16x256xf32, #tpu.memory_space<vmem>>, vector<8x256xf32>
      tpu.vector_store %arg10[%c8_27, %c0_28], %48 {strides = array<i32>} : memref<16x256xf32, #tpu.memory_space<vmem>>, vector<8x256xf32>,
      %50 = vector.extract_strided_slice %40 {offsets = [8, 0], sizes = [8, 256], strides = [1, 1]} : vector<16x256xf32> to vector<8x256xf32>
      %c0_29 = arith.constant 0 : index
      %c0_30 = arith.constant 0 : index
      %51 = vector.load %arg11[%c0_29, %c0_30] : memref<16x256xf32, #tpu.memory_space<vmem>>, vector<8x256xf32>
      tpu.vector_store %arg11[%c0_29, %c0_30], %50 {strides = array<i32>} : memref<16x256xf32, #tpu.memory_space<vmem>>, vector<8x256xf32>,
      %52 = vector.extract_strided_slice %45 {offsets = [8, 0], sizes = [8, 256], strides = [1, 1]} : vector<16x256xf32> to vector<8x256xf32>
      %c8_31 = arith.constant 8 : index
      %c0_32 = arith.constant 0 : index
      %53 = vector.load %arg11[%c8_31, %c0_32] : memref<16x256xf32, #tpu.memory_space<vmem>>, vector<8x256xf32>
      tpu.vector_store %arg11[%c8_31, %c0_32], %52 {strides = array<i32>} : memref<16x256xf32, #tpu.memory_space<vmem>>, vector<8x256xf32>,
      %cst_33 = arith.constant 0.000000e+00 : f32
      %54 = vector.broadcast %cst_33 : f32 to vector<16x256xf32>
      %c0_34 = arith.constant 0 : index
      %c0_35 = arith.constant 0 : index
      %55 = vector.load %arg12[%c0_34, %c0_35] : memref<16x256xf32, #tpu.memory_space<vmem>>, vector<16x256xf32>
      tpu.vector_store %arg12[%c0_34, %c0_35], %54 {strides = array<i32>} : memref<16x256xf32, #tpu.memory_space<vmem>>, vector<16x256xf32>,
    } else {
    }
    %c128_i32 = arith.constant 128 : i32
    %3 = arith.muli %arg1, %c128_i32 : i32
    %4 = tpu.assume_multiple %3, 128 : i32
    %c8 = arith.constant 8 : index
    %5 = arith.index_cast %4 : i32 to index
    %6 = vector.load %arg10[%c8, %5] : memref<16x256xf32, #tpu.memory_space<vmem>>, vector<8x128xf32>
    %c0 = arith.constant 0 : index
    %c0_1 = arith.constant 0 : index
    %7 = vector.load %arg10[%c0, %c0_1] : memref<16x256xf32, #tpu.memory_space<vmem>>, vector<8x256xf32>
    %8 = tpu.transpose %6, [1, 0] : vector<8x128xf32> -> vector<128x8xf32>
    %cst = arith.constant dense<0.000000e+00> : vector<128x256xf32>
    %9 = tpu.matmul %8, %7, %cst {dimension_numbers = #tpu.dot_dimension_numbers<[1], [0], [0], [1], [0, 0, 1, 1], [], []>} : vector<128x8xf32>, vector<8x256xf32>, vector<128x256xf32> -> vector<128x256xf32>
    %cst_2 = arith.constant dense<0xFF800000> : vector<128xf32>
    %10 = vector.multi_reduction <maximumf>, %9, %cst_2 [1] : vector<128x256xf32> to vector<128xf32>
    %11 = vector.shape_cast %10 : vector<128xf32> to vector<128x1xf32>
    %12 = vector.broadcast %11 : vector<128x1xf32> to vector<128x256xf32>
    %13 = arith.subf %9, %12 : vector<128x256xf32>
    %14 = math.exp %13 : vector<128x256xf32>
    %cst_3 = arith.constant dense<0.000000e+00> : vector<128xf32>
    %15 = vector.multi_reduction <add>, %14, %cst_3 [1] : vector<128x256xf32> to vector<128xf32>
    %16 = vector.shape_cast %15 : vector<128xf32> to vector<128x1xf32>
    %17 = tpu.reciprocal %16 {approx = true} : vector<128x1xf32> -> vector<128x1xf32>
    %18 = vector.broadcast %17 : vector<128x1xf32> to vector<128x256xf32>
    %19 = arith.mulf %14, %18 : vector<128x256xf32>
    %20 = arith.truncf %19 : vector<128x256xf32> to vector<128x256xbf16>
    %c0_4 = arith.constant 0 : index
    %21 = arith.index_cast %4 : i32 to index
    %22 = vector.load %arg11[%c0_4, %21] : memref<16x256xf32, #tpu.memory_space<vmem>>, vector<16x128xf32>
    %c0_5 = arith.constant 0 : index
    %c0_6 = arith.constant 0 : index
    %23 = vector.load %arg12[%c0_5, %c0_6] : memref<16x256xf32, #tpu.memory_space<vmem>>, vector<16x256xf32>
    %24 = arith.truncf %22 : vector<16x128xf32> to vector<16x128xbf16>
    %cst_7 = arith.constant dense<0.000000e+00> : vector<16x256xf32>
    %25 = tpu.matmul %24, %20, %cst_7 {dimension_numbers = #tpu.dot_dimension_numbers<[1], [0], [0], [1], [0, 0, 1, 1], [], []>} : vector<16x128xbf16>, vector<128x256xbf16>, vector<16x256xf32> -> vector<16x256xf32>
    %26 = arith.addf %23, %25 : vector<16x256xf32>
    %c0_8 = arith.constant 0 : index
    %c0_9 = arith.constant 0 : index
    %27 = vector.load %arg12[%c0_8, %c0_9] : memref<16x256xf32, #tpu.memory_space<vmem>>, vector<16x256xf32>
    tpu.vector_store %arg12[%c0_8, %c0_9], %26 {strides = array<i32>} : memref<16x256xf32, #tpu.memory_space<vmem>>, vector<16x256xf32>,
    %c1_i32 = arith.constant 1 : i32
    %28 = arith.cmpi eq, %arg1, %c1_i32 : i32
    %29 = arith.extui %28 : i1 to i32
    %c0_i32_10 = arith.constant 0 : i32
    %30 = arith.cmpi ne, %29, %c0_i32_10 : i32
    scf.if %30 {
      %c0_11 = arith.constant 0 : index
      %31 = memref.load %arg2[%c0_11] : memref<4xf32, #tpu.memory_space<smem>>
      %c1 = arith.constant 1 : index
      %32 = memref.load %arg2[%c1] : memref<4xf32, #tpu.memory_space<smem>>
      %c2 = arith.constant 2 : index
      %33 = memref.load %arg2[%c2] : memref<4xf32, #tpu.memory_space<smem>>
      %c3 = arith.constant 3 : index
      %34 = memref.load %arg2[%c3] : memref<4xf32, #tpu.memory_space<smem>>
      %c0_12 = arith.constant 0 : index
      %c0_13 = arith.constant 0 : index
      %c0_14 = arith.constant 0 : index
      %35 = vector.load %arg3[%c0_12, %c0_13, %c0_14] : memref<1x8x256xf32, #tpu.memory_space<vmem>>, vector<1x8x256xf32>
      %36 = vector.shape_cast %35 : vector<1x8x256xf32> to vector<8x256xf32>
      %c0_15 = arith.constant 0 : index
      %c0_16 = arith.constant 0 : index
      %c0_17 = arith.constant 0 : index
      %37 = vector.load %arg4[%c0_15, %c0_16, %c0_17] : memref<1x8x256xf32, #tpu.memory_space<vmem>>, vector<1x8x256xf32>
      %38 = vector.shape_cast %37 : vector<1x8x256xf32> to vector<8x256xf32>
      %c0_18 = arith.constant 0 : index
      %c0_19 = arith.constant 0 : index
      %39 = vector.load %arg11[%c0_18, %c0_19] : memref<16x256xf32, #tpu.memory_space<vmem>>, vector<8x256xf32>
      %c8_20 = arith.constant 8 : index
      %c0_21 = arith.constant 0 : index
      %40 = vector.load %arg11[%c8_20, %c0_21] : memref<16x256xf32, #tpu.memory_space<vmem>>, vector<8x256xf32>
      %c0_22 = arith.constant 0 : index
      %c0_23 = arith.constant 0 : index
      %41 = vector.load %arg12[%c0_22, %c0_23] : memref<16x256xf32, #tpu.memory_space<vmem>>, vector<8x256xf32>
      %42 = vector.broadcast %31 : f32 to vector<8x256xf32>
      %43 = arith.mulf %41, %42 : vector<8x256xf32>
      %44 = arith.addf %43, %36 : vector<8x256xf32>
      %c8_24 = arith.constant 8 : index
      %c0_25 = arith.constant 0 : index
      %45 = vector.load %arg12[%c8_24, %c0_25] : memref<16x256xf32, #tpu.memory_space<vmem>>, vector<8x256xf32>
      %46 = vector.broadcast %32 : f32 to vector<8x256xf32>
      %47 = arith.mulf %45, %46 : vector<8x256xf32>
      %48 = arith.addf %47, %38 : vector<8x256xf32>
      %49 = tpu.transpose %39, [1, 0] : vector<8x256xf32> -> vector<256x8xf32>
      %cst_26 = arith.constant dense<0.000000e+00> : vector<8x8xf32>
      %50 = tpu.matmul %40, %49, %cst_26 {dimension_numbers = #tpu.dot_dimension_numbers<[1], [0], [0], [1], [0, 0, 1, 1], [], []>} : vector<8x256xf32>, vector<256x8xf32>, vector<8x8xf32> -> vector<8x8xf32>
      %cst_27 = arith.constant dense<0x7F800000> : vector<8xf32>
      %51 = vector.multi_reduction <minimumf>, %50, %cst_27 [1] : vector<8x8xf32> to vector<8xf32>
      %52 = vector.shape_cast %51 : vector<8xf32> to vector<8x1xf32>
      %53 = vector.broadcast %52 : vector<8x1xf32> to vector<8x8xf32>
      %54 = arith.subf %53, %50 : vector<8x8xf32>
      %55 = math.exp %54 : vector<8x8xf32>
      %cst_28 = arith.constant dense<0.000000e+00> : vector<8xf32>
      %56 = vector.multi_reduction <add>, %55, %cst_28 [1] : vector<8x8xf32> to vector<8xf32>
      %57 = vector.shape_cast %56 : vector<8xf32> to vector<8x1xf32>
      %58 = tpu.reciprocal %57 {approx = true} : vector<8x1xf32> -> vector<8x1xf32>
      %59 = vector.broadcast %58 : vector<8x1xf32> to vector<8x8xf32>
      %60 = arith.mulf %55, %59 : vector<8x8xf32>
      %cst_29 = arith.constant dense<0.000000e+00> : vector<8x256xf32>
      %61 = tpu.matmul %60, %39, %cst_29 {dimension_numbers = #tpu.dot_dimension_numbers<[1], [0], [0], [1], [0, 0, 1, 1], [], []>} : vector<8x8xf32>, vector<8x256xf32>, vector<8x256xf32> -> vector<8x256xf32>
      %cst_30 = arith.constant dense<0.000000e+00> : vector<8x256xf32>
      %62 = tpu.matmul %60, %40, %cst_30 {dimension_numbers = #tpu.dot_dimension_numbers<[1], [0], [0], [1], [0, 0, 1, 1], [], []>} : vector<8x8xf32>, vector<8x256xf32>, vector<8x256xf32> -> vector<8x256xf32>
      %63 = vector.broadcast %33 : f32 to vector<8x256xf32>
      %64 = arith.mulf %63, %61 : vector<8x256xf32>
      %65 = arith.addf %64, %44 : vector<8x256xf32>
      %c0_31 = arith.constant 0 : index
      %c0_32 = arith.constant 0 : index
      %c0_33 = arith.constant 0 : index
      %66 = vector.load %arg8[%c0_31, %c0_32, %c0_33] : memref<1x8x256xf32, #tpu.memory_space<vmem>>, vector<1x8x256xf32>
      %67 = vector.shape_cast %66 : vector<1x8x256xf32> to vector<8x256xf32>
      %68 = vector.shape_cast %65 : vector<8x256xf32> to vector<1x8x256xf32>
      tpu.vector_store %arg8[%c0_31, %c0_32, %c0_33], %68 {strides = array<i32>} : memref<1x8x256xf32, #tpu.memory_space<vmem>>, vector<1x8x256xf32>,
      %69 = vector.broadcast %34 : f32 to vector<8x256xf32>
      %70 = arith.mulf %69, %62 : vector<8x256xf32>
      %71 = arith.addf %70, %48 : vector<8x256xf32>
      %c0_34 = arith.constant 0 : index
      %c0_35 = arith.constant 0 : index
      %c0_36 = arith.constant 0 : index
      %72 = vector.load %arg9[%c0_34, %c0_35, %c0_36] : memref<1x8x256xf32, #tpu.memory_space<vmem>>, vector<1x8x256xf32>
      %73 = vector.shape_cast %72 : vector<1x8x256xf32> to vector<8x256xf32>
      %74 = vector.shape_cast %71 : vector<8x256xf32> to vector<1x8x256xf32>
      tpu.vector_store %arg9[%c0_34, %c0_35, %c0_36], %74 {strides = array<i32>} : memref<1x8x256xf32, #tpu.memory_space<vmem>>, vector<1x8x256xf32>,
    } else {
    }
    return
  }
  func.func @transform_0(%arg0: i32, %arg1: i32) -> i32 {
    %c0_i32 = arith.constant 0 : i32
    %c0_i32_0 = arith.constant 0 : i32
    return %c0_i32 : i32
  }
  func.func @transform_1(%arg0: i32, %arg1: i32) -> (i32, i32, i32) {
    %c0_i32 = arith.constant 0 : i32
    %c0_i32_0 = arith.constant 0 : i32
    %c0_i32_1 = arith.constant 0 : i32
    return %arg0, %c0_i32, %c0_i32_0 : i32, i32, i32
  }
  func.func @transform_2(%arg0: i32, %arg1: i32) -> (i32, i32, i32) {
    %c0_i32 = arith.constant 0 : i32
    %c0_i32_0 = arith.constant 0 : i32
    %c0_i32_1 = arith.constant 0 : i32
    return %arg0, %c0_i32, %c0_i32_0 : i32, i32, i32
  }
  func.func @transform_3(%arg0: i32, %arg1: i32) -> (i32, i32) {
    %c0_i32 = arith.constant 0 : i32
    %c0_i32_0 = arith.constant 0 : i32
    %c0_i32_1 = arith.constant 0 : i32
    return %c0_i32, %c0_i32_0 : i32, i32
  }
  func.func @transform_4(%arg0: i32, %arg1: i32) -> (i32, i32) {
    %c0_i32 = arith.constant 0 : i32
    %c0_i32_0 = arith.constant 0 : i32
    %c0_i32_1 = arith.constant 0 : i32
    return %c0_i32, %c0_i32_0 : i32, i32
  }
  func.func @transform_5(%arg0: i32, %arg1: i32) -> (i32, i32) {
    %c0_i32 = arith.constant 0 : i32
    %c0_i32_0 = arith.constant 0 : i32
    %c0_i32_1 = arith.constant 0 : i32
    return %c0_i32, %c0_i32_0 : i32, i32
  }
  func.func @transform_6(%arg0: i32, %arg1: i32) -> (i32, i32, i32) {
    %c0_i32 = arith.constant 0 : i32
    %c0_i32_0 = arith.constant 0 : i32
    %c0_i32_1 = arith.constant 0 : i32
    return %arg0, %c0_i32, %c0_i32_0 : i32, i32, i32
  }
  func.func @transform_7(%arg0: i32, %arg1: i32) -> (i32, i32, i32) {
    %c0_i32 = arith.constant 0 : i32
    %c0_i32_0 = arith.constant 0 : i32
    %c0_i32_1 = arith.constant 0 : i32
    return %arg0, %c0_i32, %c0_i32_0 : i32, i32, i32
  }
}

</mosaic_0001>

<bundles_post_ra>
// kernel: tpu_custom_call.1
= control target key start
LH: loop header
LB: loop body
LE: loop exit
PB: predicated region body
PF: predicated region fallthrough
CT: control target
= control target key end

     0   :  { %s2407_s0 = inlined_call_operand.vmem [shape: f32[4], index: 0, kind: input, shape index: {}]   ;;  %s2408_s1 = inlined_call_operand.vmem [shape: f32[2,8,256], index: 1, kind: input, shape index: {}]   ;;  %s2409_s2 = inlined_call_operand.hbm [shape: f32[2,8,256], index: 2, kind: input, shape index: {}]   ;;  %s2410_s3 = inlined_call_operand.vmem [shape: f32[16,8], index: 3, kind: input, shape index: {}]   ;;  %s2411_s4 = inlined_call_operand.vmem [shape: f32[16,8], index: 4, kind: input, shape index: {}]   ;;  %s2412_s5 = inlined_call_operand.vmem [shape: f32[16,2], index: 5, kind: input, shape index: {}]   ;;  %s2413_s6 = inlined_call_operand.hbm [shape: f32[2,8,256], index: 6, kind: output, shape index: {0}]   ;;  %s2414_s7 = inlined_call_operand.hbm [shape: f32[2,8,256], index: 7, kind: output, shape index: {1}]  }
   0x1   :  { %2419 = sst [smem:[#allocation21_spill]] %s2407_s0 }
   0x2   :  { %2420 = sst [smem:[#allocation22_spill]] %s2414_s7 }
   0x3   :  { %13 = vsyncpa [#allocation8], 0 }
   0x4   :  { %14 = vsyncpa [#allocation6], 0 }
   0x5   :  { %16 = vsyncpa [#allocation6 + $0x1], 0 }
   0x6   :  { %17 = vsyncpa [#allocation7], 0 }
   0x7   :  { %19 = vsyncpa [#allocation7 + $0x1], 0 }
   0x8   :  { %20 = vsyncpa [#allocation12], 0 }
   0x9   :  { %22 = vsyncpa [#allocation12 + $0x1], 0  ;;  %s1887_s24 = smov 0   ;;  %s1889_s25 = smov 0  }
   0xa   :  { %s1891_s26 = smov 0   ;;  %s1893_s27 = smov 0  }
   0xb   :  { %s1895_s28 = smov 0   ;;  %s1897_s29 = smov 0  }
   0xc   :  { %s1899_s30 = smov 0   ;;  %s1901_s8 = smov 0  }
   0xd LB: > { %2421 = sst [smem:[#allocation17_spill]] %s1813_s24  ;;  %s1380_s9 = sadd.s32 4294967295, %s1841_s8   ;;  %s1841_s8 = sphi %s1901_s8, %s28_s8   ;;  %s1837_s30 = sphi %s1899_s30, %s2442_s30   ;;  %s1833_s29 = sphi %s1897_s29, %s2437_s29   ;;  %s1829_s28 = sphi %s1895_s28, %s2441_s28   ;;  %s1825_s27 = sphi %s1893_s27, %s2436_s27   ;;  %s1821_s26 = sphi %s1891_s26, %s2440_s26   ;;  %s1817_s25 = sphi %s1889_s25, %s2439_s25   ;;  %s1813_s24 = sphi %s1887_s24, %s2438_s24  }
   0xe   : > { %2422 = sst [smem:[#allocation18_spill]] %s1833_s29  ;;  %s1381_s10 = sadd.s32 4294967294, %s1841_s8  }
   0xf   : > { %p107_p0 = scmp.ne.s32.totalorder %s1817_s25, %s1813_s24  ;;  %p1931_p1 = scmp.eq.s32.totalorder %s1380_s9, 0 }
  0x10   : > { %p1935_p2 = scmp.eq.s32.totalorder %s1380_s9, 3  ;;  %p200_p3 = scmp.eq.s32.totalorder %s1381_s10, 3 }
  0x11   : > { %p1941_p4 = por %p1931_p1, %p107_p0  ;;  %p1382_p5 = scmp.ge.s32.totalorder %s1841_s8, 1 }
  0x12   : > { %p1946_p6 = por %p200_p3, %p107_p0  ;;  %p233_p7 = scmp.lt.s32.totalorder %s1841_s8, 5 }
  0x13   : > { %s2428_s0 = sld [smem:[#allocation21_spill]]  ;;  %s37_s19 = sadd.s32 1, %s1833_s29 }
  0x14   : > { %s2426_s14 = scalar_select %p1946_p6, 1, 0 }
  0x15   : > { %p1954_p8 = pnand %p1382_p5, %p233_p7  ;;  %s1843_s20 = smov [#allocation5]  }
  0x16   : > { %2427 = sst [smem:[#allocation19_spill]] %s2426_s14  ;;  %p38_p11 = scmp.ge.s32.totalorder %s37_s19, 2 }
  0x17   : > { %p1471_p9 = pneg %p1954_p8  ;;  %s40_s21 = sadd.s32 1, %s1837_s30 }
  0x18   : > { %s94_s22 = sadd.s32 1, %s1821_s26  ;;  %p101_p12 = scmp.ne.s32.totalorder %s1821_s26, %s1817_s25 }
  0x19   : > { %s245_s17 = sshll.u32 %s2428_s0, 4  ;;  %p1472_p10 = pnand %p1471_p9, %p1931_p1  ;;  %s246_s17 = int_to_ptr.vmem [resolvable:$true] %s245_s17 }
  0x1a   : > { %s2444_s19 = smov (%p38_p11, %s37_s19), 0  ;;  %s2446_s21 = smov (!%p38_p11, %s40_s21), %s1837_s30 }
  0x1b   : > { %1474 = dma.vmem_to_smem (!%p1472_p10), %s246_s17, 16, %s1843_s20, [#allocation8]  }
  0x1c   : > { %2430 = sst [smem:[#allocation20_spill]] %s2444_s19  ;;  %p102_p13 = scmp.eq.s32.totalorder %s1841_s8, 0 }
  0x1d   : > { %p1973_p0 = por %p1935_p2, %p101_p12  ;;  %p42_p3 = scmp.ge.s32.totalorder %s2446_s21, 2 }
  0x1e   : > { %p1487_p5 = scmp.lt.s32.totalorder %s1841_s8, 4  ;;  %p1978_p7 = por %p102_p13, %p101_p12 }
  0x1f   : > { %s273_s10 = sand.u32 1, %s1821_s26   ;;  %s2448_s21 = smov (%p42_p3, %s2446_s21), 0 }
  0x20   : > { %s1385_s15 = sshll.u32 %s273_s10, 4  ;;  %s91_s16 = ssub.s32 %s1837_s30, %s2448_s21 }
  0x21   : > { %p92_p9 = scmp.eq.s32.totalorder %s91_s16, 0  ;;  %s1455_s12 = sshll.u32 %s1837_s30, 4 }
  0x22   : > { %s282_s0 = scalar_lea.hbm %s2409_s2, %s1455_s12  ;;  %s277_s19 = scalar_lea.vmem [#allocation9], %s1385_s15 }
  0x23   : > { %s286_s29 = sshll.u32 %s277_s19, 4  ;;  %s284_s24 = sshll.u32 %s282_s0, 4  ;;  %s287_s29 = int_to_ptr.vmem [resolvable:$true] %s286_s29  ;;  %s285_s24 = int_to_ptr.hbm [resolvable:$true] %s284_s24 }
  0x24   : > { %s1992_s14 = scalar_select %p92_p9, %s1821_s26, %s94_s22  }
  0x25   : > { %p1476_p2 = pnand %p1487_p5, %p1978_p7  ;;  %s274_s7 = scalar_lea.sflag [#allocation6], %s273_s10 }
  0x26   : > { %295 = sbr.rel (%p1954_p8) target bundleno = 1658 (0x67a), region = 44 }
  0x27   : > { %1478 = dma.hbm_to_vmem [thread:$0]  (!%p1476_p2), %s285_s24, 256, %s287_s29, %s274_s7  }
  0x2b   : > { %1796 = dma.done.wait (%p1931_p1), [#allocation8], 16  }
  0x2c   : > { %1798 = vsyncadd (%p1931_p1), [#allocation8], 4294967280  ;;  %s2005_s19 = sand.u32 1, %s1817_s25  }
  0x2d   : > { %s1390_s0 = sshll.u32 %s2005_s19, 4  ;;  %s303_s22 = scalar_lea.sflag [#allocation6], %s2005_s19 }
  0x2e   : > { %s2009_s9 = scalar_lea.vmem [#allocation9], %s1390_s0 }
  0x2f   : > { %1800 = dma.done.wait (%p1941_p4), %s303_s22, 256  }
  0x30   : > { %1802 = vsyncadd (%p1941_p4), %s303_s22, 4294967040 }
  0x31   : > { %312 = sfence }
  0x32   : > { %p349_p8 = scmp.lt.s32.totalorder %s1829_s28, 1  ;;  %s2022_s10 = scalar_lea.vmem [#allocation10], %s1390_s0 }
  0x33   : > { %s2024_s15 = scalar_lea.vmem [#allocation11], %s1390_s0  ;;  %p1395_p1 = scmp.ne.s32.totalorder %s1825_s27, 0 }
  0x34   : > { %s350_s7 = scalar_select %p349_p8, %s1829_s28, 1 }
  0x35   : > { %357 = sbr.rel (%p1395_p1) target bundleno = 206 (0xce), region = 56 }
  0x36   : > { %s1456_s24 = sshll.u32 %s350_s7, 4 }
  0x37   : > { %s2020_s18 = scalar_lea.vmem %s2408_s1, %s1456_s24 }
  0x3a   : > { %v358_v0 = vld [vmem:[%s2020_s18] sm:$0xff]  ;;  %v359_v1 = vld [vmem:[%s2020_s18 + $0x8] sm:$0xff]  ;;  %vm376_vm0 = vcmask 64512   ;;  %v1844_v7 = vmov 1   ;;  %v1845_v8 = vmov 0   ;;  %v1846_v12 = vmov 0.0  }
  0x3b   : > { %v360_v2 = vld [vmem:[%s2009_s9] sm:$0xff]  ;;  %398 = vmatpush.msra.mxu0 %v358_v0  ;;  %421 = vmatpush.msra.mxu1 %v359_v1  ;;  %v361_v3 = vld [vmem:[%s2009_s9 + $0x8] sm:$0xff]  ;;  %499 = vst [vmem:[#allocation4 + $0x10] sm:$0xff] %v1846_v12 }
  0x3c   : > { %v364_v4 = vld [vmem:[%s2410_s3] sm:$0xff]  ;;  %460 = vmatpush.msra.mxu2 %v360_v2  ;;  %483 = vmatpush.msra.mxu3 %v361_v3  ;;  %v365_v9 = vld [vmem:[%s2410_s3 + $0x8] sm:$0xff]  ;;  %500 = vst [vmem:[#allocation4] sm:$0xff] %v1846_v12 }
  0x3d   : > { %v429_v5 = vld [vmem:[%s2411_s4] sm:$0xff]  ;;  %1396 = vmatmul.msk.f32.vlgmr.msra.gmra.mxu0 %vm376_vm0, %v364_v4  ;;  %1398 = vmatmul.msk.f32.vlgmr.msra.gmra.mxu1 %vm376_vm0, %v364_v4  ;;  %v430_v10 = vld [vmem:[%s2411_s4 + $0x8] sm:$0xff]  ;;  %501 = vst [vmem:[#allocation4 + $0x18] sm:$0xff] %v1846_v12 }
  0x3e   : > { %v362_v6 = vld [vmem:[%s2412_s5] sm:$0xff]  ;;  %1400 = vmatmul.msk.f32.vlgmr.msra.gmra.mxu2 %vm376_vm0, %v429_v5  ;;  %1402 = vmatmul.msk.f32.vlgmr.msra.gmra.mxu3 %vm376_vm0, %v429_v5  ;;  %v363_v11 = vld [vmem:[%s2412_s5 + $0x8] sm:$0xff]  ;;  %502 = vst [vmem:[#allocation4 + $0x8] sm:$0xff] %v1846_v12 }
  0x3f   : > { %1560 = vset.pattern.permute.xlu1 %v1844_v7  ;;  %1559 = vset.pattern.permute.xlu0 %v1845_v8 }
  0x40   : > { %432 = vperm.xlu1 %1560, %v362_v6   ;;  %368 = vperm.xlu0 %1559, %v362_v6  }
  0x45   : > { %1397 = vmatmul.msk.f32.gmra.mxu0 %vm376_vm0, %v365_v9  ;;  %1399 = vmatmul.msk.f32.gmra.mxu1 %vm376_vm0, %v365_v9 }
  0x46   : > { %1401 = vmatmul.msk.f32.gmra.mxu2 %vm376_vm0, %v430_v10  ;;  %1403 = vmatmul.msk.f32.gmra.mxu3 %vm376_vm0, %v430_v10 }
  0x48   : > { %436 = vperm.xlu1 %1560, %v363_v11   ;;  %373 = vperm.xlu0 %1559, %v363_v11  }
  0x50   : > { %1561 = vset.pattern.permute.xlu0 %v1844_v7 }
  0xb2   : > { %v369_v13 = vpop.permute.xlu0 %368  ;;  %v433_v18 = vpop.permute.xlu1 %432 }
  0xba   : > { %v400_v14 = vpop.f32.mrf.mxu0  ;;  %v423_v15 = vpop.f32.mrf.mxu1 }
  0xbb   : > { %v401_v16 = vadd.f32 %v400_v14, %v369_v13  ;;  %v424_v17 = vadd.f32 %v423_v15, %v369_v13  ;;  %v374_v19 = vpop.permute.xlu0 %373  ;;  %v437_v28 = vpop.permute.xlu1 %436 }
  0xbd   : > { %491 = vst [vmem:[#allocation2] sm:$0xff] %v401_v16 }
  0xbe   : > { %492 = vst [vmem:[#allocation2 + $0x8] sm:$0xff] %v424_v17 }
  0xc1   : > { %v462_v20 = vpop.f32.mrf.mxu2  ;;  %v485_v21 = vpop.f32.mrf.mxu3 }
  0xc2   : > { %v463_v22 = vadd.f32 %v462_v20, %v433_v18  ;;  %v486_v23 = vadd.f32 %v485_v21, %v433_v18  ;;  %v403_v24 = vpop.f32.mrf.mxu0  ;;  %v426_v25 = vpop.f32.mrf.mxu1 }
  0xc3   : > { %v404_v26 = vadd.f32 %v403_v24, %v374_v19  ;;  %v427_v27 = vadd.f32 %v426_v25, %v374_v19 }
  0xc4   : > { %493 = vst [vmem:[#allocation2 + $0x10] sm:$0xff] %v463_v22 }
  0xc5   : > { %494 = vst [vmem:[#allocation2 + $0x18] sm:$0xff] %v486_v23 }
  0xc6   : > { %495 = vst [vmem:[#allocation3] sm:$0xff] %v404_v26 }
  0xc7   : > { %496 = vst [vmem:[#allocation3 + $0x8] sm:$0xff] %v427_v27 }
  0xc9   : > { %v465_v29 = vpop.f32.mrf.mxu2  ;;  %v488_v30 = vpop.f32.mrf.mxu3 }
  0xca   : > { %v466_v31 = vadd.f32 %v465_v29, %v437_v28  ;;  %v489_v32 = vadd.f32 %v488_v30, %v437_v28 }
  0xcc   : > { %497 = vst [vmem:[#allocation3 + $0x10] sm:$0xff] %v466_v31 }
  0xcd   : > { %498 = vst [vmem:[#allocation3 + $0x18] sm:$0xff] %v489_v32 }
  0xce PF: > { %s1404_s16 = sshll.u32 %s1825_s27, 7  ;;  %v509_v33 = vld [vmem:[#allocation2] sm:$0xff]  ;;  %v510_v34 = vld [vmem:[#allocation2 + $0x8] sm:$0xff]  ;;  %vm543_vm1 = vcmask 64512   ;;  %p1439_p4 = scmp.ne.s32.totalorder %s1825_s27, 1 }
  0xcf   : > { %s2058_s12 = sshra.s32 %s1404_s16, 7  ;;  %607 = vmatpush.msra.mxu0 %v509_v33  ;;  %672 = vmatpush.msra.mxu1 %v510_v34  ;;  %s1027_s27 = sld [smem:[#allocation5]] (!%p1439_p4) }
  0xd0   : > { %s1405_s17 = sshll.u32 %s2058_s12, 3  ;;  %1460 = vmatpush.msra.mxu3 %v510_v34  ;;  %1459 = vmatpush.msra.mxu2 %v509_v33  ;;  %s1441_s22 = sld [smem:[#allocation5 + $0x2]] (!%p1439_p4) }
  0xd1   : > { %s507_s20 = scalar_lea.vmem [#allocation2], %s1405_s17  ;;  %s979_s0 = scalar_lea.vmem [#allocation3], %s1405_s17 }
  0xd2   : > { %v508_v35 = vld [vmem:[%s507_s20 + $0x10] sm:$0xff]  ;;  %s1440_s7 = sld [smem:[#allocation5 + $0x1]] (!%p1439_p4) }
  0xd3   : > { %511 = vxpose.xlu0.b32.start.end [1/1] (short) %v508_v35, 128  ;;  %s1442_s24 = sld [smem:[#allocation5 + $0x3]] (!%p1439_p4) }
 0x177   : > { %v527_v36 = vpop.trf.xlu0 }
 0x178   : > { %1406 = vmatmul.msk.f32.vlgmr.msra.gmra.mxu0 %vm543_vm1, %v527_v36  ;;  %1422 = vmatmul.msk.f32.vlgmr.msra.gmra.mxu1 %vm543_vm1, %v527_v36 }
 0x17f   : > { %v528_v37 = vpop.trf.xlu0 }
 0x180   : > { %1407 = vmatmul.msk.f32.gmra.mxu0 %vm543_vm1, %v528_v37  ;;  %1423 = vmatmul.msk.f32.gmra.mxu1 %vm543_vm1, %v528_v37 }
 0x187   : > { %v529_v38 = vpop.trf.xlu0 }
 0x188   : > { %1408 = vmatmul.msk.f32.gmra.mxu0 %vm543_vm1, %v529_v38  ;;  %1424 = vmatmul.msk.f32.gmra.mxu1 %vm543_vm1, %v529_v38 }
 0x18f   : > { %v530_v39 = vpop.trf.xlu0 }
 0x190   : > { %1409 = vmatmul.msk.f32.gmra.mxu0 %vm543_vm1, %v530_v39  ;;  %1425 = vmatmul.msk.f32.gmra.mxu1 %vm543_vm1, %v530_v39 }
 0x197   : > { %v531_v40 = vpop.trf.xlu0 }
 0x198   : > { %1410 = vmatmul.msk.f32.gmra.mxu0 %vm543_vm1, %v531_v40  ;;  %1426 = vmatmul.msk.f32.gmra.mxu1 %vm543_vm1, %v531_v40 }
 0x19f   : > { %v532_v41 = vpop.trf.xlu0 }
 0x1a0   : > { %1411 = vmatmul.msk.f32.gmra.mxu0 %vm543_vm1, %v532_v41  ;;  %1427 = vmatmul.msk.f32.gmra.mxu1 %vm543_vm1, %v532_v41 }
 0x1a7   : > { %v533_v42 = vpop.trf.xlu0 }
 0x1a8   : > { %1412 = vmatmul.msk.f32.gmra.mxu0 %vm543_vm1, %v533_v42  ;;  %1428 = vmatmul.msk.f32.gmra.mxu1 %vm543_vm1, %v533_v42 }
 0x1af   : > { %v534_v43 = vpop.trf.xlu0 }
 0x1b0   : > { %1413 = vmatmul.msk.f32.gmra.mxu0 %vm543_vm1, %v534_v43  ;;  %1429 = vmatmul.msk.f32.gmra.mxu1 %vm543_vm1, %v534_v43 }
 0x1b7   : > { %v535_v44 = vpop.trf.xlu0 }
 0x1b8   : > { %1414 = vmatmul.msk.f32.gmra.mxu0 %vm543_vm1, %v535_v44  ;;  %1430 = vmatmul.msk.f32.gmra.mxu1 %vm543_vm1, %v535_v44 }
 0x1bf   : > { %v536_v45 = vpop.trf.xlu0 }
 0x1c0   : > { %1415 = vmatmul.msk.f32.gmra.mxu0 %vm543_vm1, %v536_v45  ;;  %1431 = vmatmul.msk.f32.vlgmr.msra.gmra.mxu3 %vm543_vm1, %v536_v45 }
 0x1c7   : > { %v537_v46 = vpop.trf.xlu0 }
 0x1c8   : > { %1416 = vmatmul.msk.f32.vlgmr.msra.gmra.mxu2 %vm543_vm1, %v537_v46  ;;  %1432 = vmatmul.msk.f32.gmra.mxu3 %vm543_vm1, %v537_v46 }
 0x1cf   : > { %v538_v47 = vpop.trf.xlu0 }
 0x1d0   : > { %1417 = vmatmul.msk.f32.gmra.mxu2 %vm543_vm1, %v538_v47  ;;  %1433 = vmatmul.msk.f32.gmra.mxu3 %vm543_vm1, %v538_v47 }
 0x1d7   : > { %v539_v48 = vpop.trf.xlu0 }
 0x1d8   : > { %1418 = vmatmul.msk.f32.gmra.mxu2 %vm543_vm1, %v539_v48  ;;  %1434 = vmatmul.msk.f32.gmra.mxu3 %vm543_vm1, %v539_v48 }
 0x1df   : > { %v540_v49 = vpop.trf.xlu0 }
 0x1e0   : > { %1419 = vmatmul.msk.f32.gmra.mxu2 %vm543_vm1, %v540_v49  ;;  %1435 = vmatmul.msk.f32.gmra.mxu3 %vm543_vm1, %v540_v49 }
 0x1e7   : > { %v541_v50 = vpop.trf.xlu0 }
 0x1e8   : > { %1420 = vmatmul.msk.f32.gmra.mxu2 %vm543_vm1, %v541_v50  ;;  %1436 = vmatmul.msk.f32.gmra.mxu3 %vm543_vm1, %v541_v50 }
 0x1ef   : > { %v542_v51 = vpop.trf.xlu0 }
 0x1f0   : > { %1421 = vmatmul.msk.f32.gmra.mxu2 %vm543_vm1, %v542_v51  ;;  %1437 = vmatmul.msk.f32.gmra.mxu3 %vm543_vm1, %v542_v51 }
 0x1f5   : > { %v2095_v52 = vpop.f32.mrf.mxu0  ;;  %v2099_v54 = vpop.f32.mrf.mxu1 }
 0x1f6   : > { %v722_v34 = vmax.f32 %v2095_v52, %v2099_v54 }
 0x1fd   : > { %v2097_v53 = vpop.f32.mrf.mxu0  ;;  %v2103_v56 = vpop.f32.mrf.mxu1 }
 0x1fe   : > { %v725_v35 = vmax.f32 %v2097_v53, %v2103_v56 }
 0x205   : > { %v2101_v55 = vpop.f32.mrf.mxu0  ;;  %v2107_v58 = vpop.f32.mrf.mxu1 }
 0x206   : > { %v728_v32 = vmax.f32 %v2101_v55, %v2107_v58 }
 0x20d   : > { %v2105_v57 = vpop.f32.mrf.mxu0  ;;  %v2111_v60 = vpop.f32.mrf.mxu1 }
 0x20e   : > { %v731_v33 = vmax.f32 %v2105_v57, %v2111_v60 }
 0x215   : > { %v2109_v59 = vpop.f32.mrf.mxu0  ;;  %v2117_v63 = vpop.f32.mrf.mxu1 }
 0x216   : > { %v734_v30 = vmax.f32 %v2109_v59, %v2117_v63 }
 0x21d   : > { %v2113_v61 = vpop.f32.mrf.mxu0  ;;  %v2125_v3 = vpop.f32.mrf.mxu1 }
 0x21e   : > { %v737_v31 = vmax.f32 %v2113_v61, %v2125_v3 }
 0x225   : > { %v2123_v2 = vpop.f32.mrf.mxu0  ;;  %v2135_v10 = vpop.f32.mrf.mxu1 }
 0x226   : > { %v740_v29 = vmax.f32 %v2123_v2, %v2135_v10 }
 0x22d   : > { %v2127_v6 = vpop.f32.mrf.mxu0  ;;  %v2143_v16 = vpop.f32.mrf.mxu1 }
 0x22e   : > { %v743_v25 = vmax.f32 %v2127_v6, %v2143_v16 }
 0x235   : > { %v633_v11 = vpop.f32.mrf.mxu0  ;;  %v698_v23 = vpop.f32.mrf.mxu1 }
 0x236   : > { %v746_v24 = vmax.f32 %v633_v11, %v698_v23 }
 0x23d   : > { %v636_v17 = vpop.f32.mrf.mxu0 }
 0x243   : > { %v2115_v62 = vpop.f32.mrf.mxu3 }
 0x244   : > { %v749_v20 = vmax.f32 %v636_v17, %v2115_v62 }
 0x24b   : > { %v2119_v0 = vpop.f32.mrf.mxu2  ;;  %v2121_v1 = vpop.f32.mrf.mxu3 }
 0x24c   : > { %v752_v21 = vmax.f32 %v2119_v0, %v2121_v1 }
 0x253   : > { %v642_v4 = vpop.f32.mrf.mxu2  ;;  %v707_v5 = vpop.f32.mrf.mxu3 }
 0x254   : > { %v755_v14 = vmax.f32 %v642_v4, %v707_v5 }
 0x25b   : > { %v2129_v7 = vpop.f32.mrf.mxu2  ;;  %v2131_v8 = vpop.f32.mrf.mxu3 }
 0x25c   : > { %v758_v9 = vmax.f32 %v2129_v7, %v2131_v8 }
 0x25e   : > { %759 = vmax.xlane.f32.xlu1 %v758_v9 }
 0x263   : > { %v2137_v12 = vpop.f32.mrf.mxu2  ;;  %v2139_v13 = vpop.f32.mrf.mxu3 }
 0x264   : > { %v761_v15 = vmax.f32 %v2137_v12, %v2139_v13 }
 0x266   : > { %756 = vmax.xlane.f32.xlu1 %v755_v14  ;;  %762 = vmax.xlane.f32.xlu2 %v761_v15 }
 0x26b   : > { %v2145_v18 = vpop.f32.mrf.mxu2  ;;  %v2147_v19 = vpop.f32.mrf.mxu3 }
 0x26c   : > { %v764_v22 = vmax.f32 %v2145_v18, %v2147_v19 }
 0x26e   : > { %750 = vmax.xlane.f32.xlu1 %v749_v20  ;;  %753 = vmax.xlane.f32.xlu2 %v752_v21 }
 0x26f   : > { %765 = vmax.xlane.f32.xlu0 %v764_v22 }
 0x273   : > { %v2156_v26 = vpop.f32.mrf.mxu2  ;;  %v2158_v27 = vpop.f32.mrf.mxu3 }
 0x274   : > { %v767_v28 = vmax.f32 %v2156_v26, %v2158_v27 }
 0x276   : > { %744 = vmax.xlane.f32.xlu1 %v743_v25  ;;  %747 = vmax.xlane.f32.xlu2 %v746_v24 }
 0x27e   : > { %741 = vmax.xlane.f32.xlu2 %v740_v29  ;;  %768 = vmax.xlane.f32.xlu1 %v767_v28 }
 0x286   : > { %735 = vmax.xlane.f32.xlu2 %v734_v30  ;;  %738 = vmax.xlane.f32.xlu1 %v737_v31 }
 0x28e   : > { %729 = vmax.xlane.f32.xlu2 %v728_v32  ;;  %732 = vmax.xlane.f32.xlu1 %v731_v33 }
 0x296   : > { %723 = vmax.xlane.f32.xlu2 %v722_v34  ;;  %726 = vmax.xlane.f32.xlu1 %v725_v35 }
 0x2d1   : > { %v760_v36 = vpop.xlane.xlu1 %759 }
 0x2d2   : > { %v795_v33 = vsub.f32 %v2131_v8, %v760_v36 }
 0x2d9   : > { %v757_v37 = vpop.xlane.xlu1 %756  ;;  %v763_v38 = vpop.xlane.xlu2 %762 }
 0x2da   : > { %v792_v43 = vsub.f32 %v642_v4, %v757_v37  ;;  %v793_v46 = vsub.f32 %v707_v5, %v757_v37  ;;  %v796_v15 = vsub.f32 %v2137_v12, %v763_v38 }
 0x2dc   : > { %v846_v47 = vmul.f32 1.442695, %v792_v43  ;;  %v848_v48 = vmul.f32 1.442695, %v793_v46  ;;  %v854_v22 = vmul.f32 1.442695, %v796_v15 }
 0x2e1   : > { %v751_v39 = vpop.xlane.xlu1 %750  ;;  %v754_v40 = vpop.xlane.xlu2 %753 }
 0x2e2   : > { %v788_v41 = vsub.f32 %v636_v17, %v751_v39  ;;  %v789_v42 = vsub.f32 %v2115_v62, %v751_v39  ;;  %v797_v62 = vsub.f32 %v2139_v13, %v763_v38  ;;  %v790_v5 = vsub.f32 %v2119_v0, %v754_v40  ;;  %v766_v39 = vpop.xlane.xlu0 %765 }
 0x2e3   : > { %v852_v38 = vmul.f32 1.442695, %v795_v33  ;;  %v799_v46 = vsub.f32 %v2147_v19, %v766_v39 }
 0x2e4   : > { %v838_v44 = vmul.f32 1.442695, %v788_v41  ;;  %v840_v45 = vmul.f32 1.442695, %v789_v42  ;;  %v842_v25 = vmul.f32 1.442695, %v790_v5 }
 0x2e6   : > { %1562 = vpow2.f32 %v838_v44  ;;  %v798_v44 = vsub.f32 %v2145_v18, %v766_v39 }
 0x2e7   : > { %1564 = vpow2.f32 %v840_v45 }
 0x2e8   : > { %1566 = vpow2.f32 %v846_v47 }
 0x2e9   : > { %v745_v49 = vpop.xlane.xlu1 %744  ;;  %v748_v50 = vpop.xlane.xlu2 %747  ;;  %1568 = vpow2.f32 %v848_v48 }
 0x2ea   : > { %v786_v51 = vsub.f32 %v633_v11, %v748_v50  ;;  %v787_v9 = vsub.f32 %v698_v23, %v748_v50  ;;  %v791_v11 = vsub.f32 %v2121_v1, %v754_v40  ;;  %v856_v23 = vmul.f32 1.442695, %v797_v62 }
 0x2eb   : > { %v794_v1 = vsub.f32 %v2129_v7, %v760_v36  ;;  %v784_v41 = vsub.f32 %v2127_v6, %v745_v49  ;;  %v785_v36 = vsub.f32 %v2143_v16, %v745_v49  ;;  %v858_v16 = vmul.f32 1.442695, %v798_v44 }
 0x2ec   : > { %v2177_v14 = vpop.eup %1562  ;;  %v834_v17 = vmul.f32 1.442695, %v786_v51  ;;  %v836_v4 = vmul.f32 1.442695, %v787_v9  ;;  %v844_v13 = vmul.f32 1.442695, %v791_v11 }
 0x2ed   : > { %v2180_v20 = vpop.eup %1564  ;;  %v850_v37 = vmul.f32 1.442695, %v794_v1  ;;  %v830_v47 = vmul.f32 1.442695, %v784_v41  ;;  %v832_v48 = vmul.f32 1.442695, %v785_v36 }
 0x2ee   : > { %v893_v21 = vadd.f32 %v2180_v20, %v2177_v14  ;;  %1570 = vpow2.f32 %v834_v17  ;;  %v2187_v24 = vpop.eup %1566  ;;  %v860_v51 = vmul.f32 1.442695, %v799_v46 }
 0x2ef   : > { %1572 = vpow2.f32 %v836_v4  ;;  %v2189_v28 = vpop.eup %1568 }
 0x2f0   : > { %894 = vadd.xlane.f32.xlu1 %v893_v21  ;;  %1574 = vpow2.f32 %v854_v22  ;;  %v899_v31 = vadd.f32 %v2189_v28, %v2187_v24 }
 0x2f1   : > { %v769_v12 = vpop.xlane.xlu1 %768  ;;  %1576 = vpow2.f32 %v856_v23  ;;  %v742_v42 = vpop.xlane.xlu2 %741 }
 0x2f2   : > { %v800_v0 = vsub.f32 %v2156_v26, %v769_v12  ;;  %v801_v29 = vsub.f32 %v2158_v27, %v769_v12  ;;  %1578 = vpow2.f32 %v842_v25  ;;  %v782_v17 = vsub.f32 %v2123_v2, %v742_v42 }
 0x2f3   : > { %1580 = vpow2.f32 %v844_v13  ;;  %v783_v4 = vsub.f32 %v2135_v10, %v742_v42 }
 0x2f4   : > { %v2193_v30 = vpop.eup %1570  ;;  %v862_v34 = vmul.f32 1.442695, %v800_v0  ;;  %v864_v35 = vmul.f32 1.442695, %v801_v29 }
 0x2f5   : > { %v2198_v32 = vpop.eup %1572  ;;  %v828_v2 = vmul.f32 1.442695, %v783_v4 }
 0x2f6   : > { %v890_v26 = vadd.f32 %v2198_v32, %v2193_v30  ;;  %v2203_v27 = vpop.eup %1574  ;;  %1582 = vpow2.f32 %v862_v34 }
 0x2f7   : > { %v2205_v7 = vpop.eup %1576  ;;  %1584 = vpow2.f32 %v864_v35 }
 0x2f8   : > { %900 = vadd.xlane.f32.xlu1 %v899_v31  ;;  %891 = vadd.xlane.f32.xlu2 %v890_v26  ;;  %v2207_v40 = vpop.eup %1578  ;;  %1586 = vpow2.f32 %v850_v37  ;;  %v905_v45 = vadd.f32 %v2205_v7, %v2203_v27 }
 0x2f9   : > { %v2210_v8 = vpop.eup %1580  ;;  %v739_v43 = vpop.xlane.xlu1 %738  ;;  %1588 = vpow2.f32 %v852_v38 }
 0x2fa   : > { %v896_v6 = vadd.f32 %v2210_v8, %v2207_v40  ;;  %1590 = vpow2.f32 %v830_v47  ;;  %v780_v9 = vsub.f32 %v2113_v61, %v739_v43  ;;  %v781_v19 = vsub.f32 %v2125_v3, %v739_v43  ;;  %v736_v5 = vpop.xlane.xlu2 %735 }
 0x2fb   : > { %1592 = vpow2.f32 %v832_v48  ;;  %v826_v3 = vmul.f32 1.442695, %v782_v17  ;;  %v778_v29 = vsub.f32 %v2109_v59, %v736_v5  ;;  %v779_v31 = vsub.f32 %v2117_v63, %v736_v5 }
 0x2fc   : > { %v2219_v50 = vpop.eup %1582  ;;  %1594 = vpow2.f32 %v858_v16  ;;  %v822_v11 = vmul.f32 1.442695, %v780_v9  ;;  %v824_v22 = vmul.f32 1.442695, %v781_v19 }
 0x2fd   : > { %v2221_v49 = vpop.eup %1584  ;;  %1596 = vpow2.f32 %v860_v51  ;;  %v820_v59 = vmul.f32 1.442695, %v779_v31 }
 0x2fe   : > { %v2223_v18 = vpop.eup %1586  ;;  %v911_v62 = vadd.f32 %v2221_v49, %v2219_v50  ;;  %1598 = vpow2.f32 %v822_v11 }
 0x2ff   : > { %v2226_v15 = vpop.eup %1588  ;;  %1600 = vpow2.f32 %v824_v22 }
 0x300   : > { %906 = vadd.xlane.f32.xlu1 %v905_v45  ;;  %897 = vadd.xlane.f32.xlu2 %v896_v6  ;;  %v902_v61 = vadd.f32 %v2226_v15, %v2223_v18  ;;  %v2235_v23 = vpop.eup %1590  ;;  %1602 = vpow2.f32 %v826_v3 }
 0x301   : > { %v733_v21 = vpop.xlane.xlu1 %732  ;;  %v2237_v12 = vpop.eup %1592  ;;  %1604 = vpow2.f32 %v828_v2 }
 0x302   : > { %v2239_v25 = vpop.eup %1594  ;;  %v776_v10 = vsub.f32 %v2105_v57, %v733_v21  ;;  %v777_v0 = vsub.f32 %v2111_v60, %v733_v21  ;;  %v887_v1 = vadd.f32 %v2237_v12, %v2235_v23  ;;  %v730_v57 = vpop.xlane.xlu2 %729  ;;  %v818_v60 = vmul.f32 1.442695, %v778_v29 }
 0x303   : > { %v2242_v13 = vpop.eup %1596  ;;  %v774_v42 = vsub.f32 %v2101_v55, %v730_v57  ;;  %v775_v44 = vsub.f32 %v2107_v58, %v730_v57 }
 0x304   : > { %v814_v33 = vmul.f32 1.442695, %v776_v10  ;;  %v908_v34 = vadd.f32 %v2242_v13, %v2239_v25  ;;  %v816_v26 = vmul.f32 1.442695, %v777_v0  ;;  %v2251_v37 = vpop.eup %1598 }
 0x305   : > { %v2253_v38 = vpop.eup %1600  ;;  %v810_v6 = vmul.f32 1.442695, %v774_v42  ;;  %v812_v48 = vmul.f32 1.442695, %v775_v44 }
 0x306   : > { %v2255_v39 = vpop.eup %1602  ;;  %1606 = vpow2.f32 %v814_v33  ;;  %v881_v43 = vadd.f32 %v2253_v38, %v2251_v37 }
 0x307   : > { %v2258_v41 = vpop.eup %1604  ;;  %1608 = vpow2.f32 %v816_v26 }
 0x308   : > { %912 = vadd.xlane.f32.xlu1 %v911_v62  ;;  %903 = vadd.xlane.f32.xlu2 %v902_v61  ;;  %1610 = vpow2.f32 %v818_v60  ;;  %v884_v46 = vadd.f32 %v2258_v41, %v2255_v39 }
 0x309   : > { %v727_v35 = vpop.xlane.xlu1 %726  ;;  %1612 = vpow2.f32 %v820_v59 }
 0x30a   : > { %v772_v63 = vsub.f32 %v2097_v53, %v727_v35  ;;  %v773_v36 = vsub.f32 %v2103_v56, %v727_v35  ;;  %v724_v55 = vpop.xlane.xlu2 %723 }
 0x30b   : > { %v770_v58 = vsub.f32 %v2095_v52, %v724_v55  ;;  %v771_v19 = vsub.f32 %v2099_v54, %v724_v55 }
 0x30c   : > { %v806_v45 = vmul.f32 1.442695, %v772_v63  ;;  %v808_v53 = vmul.f32 1.442695, %v773_v36  ;;  %v2267_v47 = vpop.eup %1606 }
 0x30d   : > { %v2269_v56 = vpop.eup %1608  ;;  %v802_v4 = vmul.f32 1.442695, %v770_v58  ;;  %v804_v21 = vmul.f32 1.442695, %v771_v19 }
 0x30e   : > { %v2271_v16 = vpop.eup %1610  ;;  %1614 = vpow2.f32 %v806_v45  ;;  %v875_v9 = vadd.f32 %v2269_v56, %v2267_v47 }
 0x30f   : > { %v2273_v51 = vpop.eup %1612  ;;  %1616 = vpow2.f32 %v808_v53 }
 0x310   : > { %888 = vadd.xlane.f32.xlu1 %v887_v1  ;;  %909 = vadd.xlane.f32.xlu2 %v908_v34  ;;  %1618 = vpow2.f32 %v810_v6  ;;  %v878_v17 = vadd.f32 %v2273_v51, %v2271_v16 }
 0x311   : > { %1620 = vpow2.f32 %v812_v48 }
 0x312   : > { %1622 = vpow2.f32 %v802_v4 }
 0x313   : > { %1624 = vpow2.f32 %v804_v21 }
 0x314   : > { %v2281_v62 = vpop.eup %1614 }
 0x315   : > { %v2283_v5 = vpop.eup %1616 }
 0x316   : > { %v2285_v11 = vpop.eup %1618  ;;  %v869_v61 = vadd.f32 %v2283_v5, %v2281_v62 }
 0x317   : > { %v2287_v52 = vpop.eup %1620 }
 0x318   : > { %882 = vadd.xlane.f32.xlu1 %v881_v43  ;;  %885 = vadd.xlane.f32.xlu2 %v884_v46  ;;  %v872_v54 = vadd.f32 %v2287_v52, %v2285_v11  ;;  %v2293_v22 = vpop.eup %1622 }
 0x319   : > { %v2295_v3 = vpop.eup %1624 }
 0x31a   : > { %v866_v2 = vadd.f32 %v2295_v3, %v2293_v22 }
 0x320   : > { %876 = vadd.xlane.f32.xlu1 %v875_v9  ;;  %879 = vadd.xlane.f32.xlu2 %v878_v17 }
 0x328   : > { %870 = vadd.xlane.f32.xlu1 %v869_v61  ;;  %873 = vadd.xlane.f32.xlu2 %v872_v54 }
 0x330   : > { %867 = vadd.xlane.f32.xlu2 %v866_v2 }
 0x363   : > { %v895_v10 = vpop.xlane.xlu1 %894 }
 0x36b   : > { %v901_v0 = vpop.xlane.xlu1 %900  ;;  %v892_v29 = vpop.xlane.xlu2 %891 }
 0x373   : > { %v907_v1 = vpop.xlane.xlu1 %906  ;;  %v898_v31 = vpop.xlane.xlu2 %897 }
 0x37b   : > { %v913_v33 = vpop.xlane.xlu1 %912  ;;  %v904_v34 = vpop.xlane.xlu2 %903 }
 0x37c   : > { %1626 = vrcp.f32 %v913_v33 }
 0x37d   : > { %1628 = vrcp.f32 %v904_v34 }
 0x382   : > { %v1627_v35 = vpop.eup %1626 }
 0x383   : > { %v889_v57 = vpop.xlane.xlu1 %888  ;;  %v910_v26 = vpop.xlane.xlu2 %909  ;;  %v960_v43 = vmul.f32 %v1627_v35, %v2219_v50  ;;  %v961_v45 = vmul.f32 %v1627_v35, %v2221_v49 }
 0x384   : > { %1630 = vrcp.f32 %v910_v26  ;;  %v1629_v60 = vpop.eup %1628 }
 0x385   : > { %1632 = vrcp.f32 %v907_v1  ;;  %v954_v48 = vmul.f32 %v1629_v60, %v2223_v18  ;;  %v955_v55 = vmul.f32 %v1629_v60, %v2226_v15 }
 0x386   : > { %1634 = vrcp.f32 %v898_v31 }
 0x387   : > { %1636 = vrcp.f32 %v901_v0 }
 0x388   : > { %1638 = vrcp.f32 %v892_v29 }
 0x389   : > { %1640 = vrcp.f32 %v895_v10 }
 0x38a   : > { %v1631_v59 = vpop.eup %1630 }
 0x38b   : > { %v883_v63 = vpop.xlane.xlu1 %882  ;;  %v886_v36 = vpop.xlane.xlu2 %885  ;;  %v958_v42 = vmul.f32 %v1631_v59, %v2239_v25  ;;  %v959_v44 = vmul.f32 %v1631_v59, %v2242_v13 }
 0x38c   : > { %v1633_v46 = vpop.eup %1632  ;;  %1642 = vrcp.f32 %v886_v36 }
 0x38d   : > { %v976_v53 = vpack.c.bf16 %v960_v43, %v958_v42  ;;  %v977_v6 = vpack.c.bf16 %v961_v45, %v959_v44  ;;  %v1635_v58 = vpop.eup %1634  ;;  %v956_v25 = vmul.f32 %v1633_v46, %v2203_v27  ;;  %v957_v50 = vmul.f32 %v1633_v46, %v2205_v7  ;;  %v980_v46 = vld [vmem:[%s979_s0] sm:$0xff] }
 0x38e   : > { %v1637_v9 = vpop.eup %1636  ;;  %v950_v17 = vmul.f32 %v1635_v58, %v2207_v40  ;;  %v951_v4 = vmul.f32 %v1635_v58, %v2210_v8  ;;  %1644 = vrcp.f32 %v889_v57  ;;  %v982_v58 = vld [vmem:[#allocation4 + $0x10] sm:$0xff] }
 0x38f   : > { %987 = vmatpush.bf16.msrb.mxu2 %v976_v53  ;;  %1001 = vmatpush.bf16.msrb.mxu3 %v977_v6  ;;  %v1639_v19 = vpop.eup %1638  ;;  %v974_v13 = vpack.c.bf16 %v956_v25, %v954_v48  ;;  %v975_v49 = vpack.c.bf16 %v957_v50, %v955_v55  ;;  %v952_v15 = vmul.f32 %v1637_v9, %v2187_v24 }
 0x390   : > { %v1641_v21 = vpop.eup %1640  ;;  %v953_v61 = vmul.f32 %v1637_v9, %v2189_v28  ;;  %v946_v27 = vmul.f32 %v1639_v19, %v2193_v30  ;;  %v947_v10 = vmul.f32 %v1639_v19, %v2198_v32  ;;  %v983_v9 = vld [vmem:[#allocation4] sm:$0xff] }
 0x391   : > { %v972_v54 = vpack.c.bf16 %v952_v15, %v950_v17  ;;  %v948_v8 = vmul.f32 %v1641_v21, %v2177_v14  ;;  %v949_v0 = vmul.f32 %v1641_v21, %v2180_v20 }
 0x392   : > { %v973_v2 = vpack.c.bf16 %v953_v61, %v951_v4  ;;  %v1643_v40 = vpop.eup %1642 }
 0x393   : > { %988 = vmatpush.bf16.msrb.mxu2 %v974_v13  ;;  %1002 = vmatpush.bf16.msrb.mxu3 %v975_v49  ;;  %v880_v18 = vpop.xlane.xlu2 %879  ;;  %v877_v7 = vpop.xlane.xlu1 %876  ;;  %v970_v24 = vpack.c.bf16 %v948_v8, %v946_v27  ;;  %v971_v28 = vpack.c.bf16 %v949_v0, %v947_v10  ;;  %v942_v1 = vmul.f32 %v1643_v40, %v2255_v39 }
 0x394   : > { %1646 = vrcp.f32 %v880_v18  ;;  %v1645_v29 = vpop.eup %1644  ;;  %v943_v30 = vmul.f32 %v1643_v40, %v2258_v41 }
 0x395   : > { %1648 = vrcp.f32 %v883_v63  ;;  %v944_v33 = vmul.f32 %v1645_v29, %v2235_v23  ;;  %v945_v14 = vmul.f32 %v1645_v29, %v2237_v12 }
 0x396   : > { %1650 = vrcp.f32 %v877_v7 }
 0x397   : > { %989 = vmatpush.bf16.msrb.mxu2 %v972_v54  ;;  %1003 = vmatpush.bf16.msrb.mxu3 %v973_v2  ;;  %v968_v57 = vpack.c.bf16 %v944_v33, %v942_v1  ;;  %v969_v20 = vpack.c.bf16 %v945_v14, %v943_v30 }
 0x39a   : > { %v1647_v31 = vpop.eup %1646 }
 0x39b   : > { %990 = vmatpush.bf16.msrb.mxu2 %v970_v24  ;;  %1004 = vmatpush.bf16.msrb.mxu3 %v971_v28  ;;  %v874_v32 = vpop.xlane.xlu2 %873  ;;  %v1649_v34 = vpop.eup %1648  ;;  %v938_v26 = vmul.f32 %v1647_v31, %v2271_v16  ;;  %v939_v35 = vmul.f32 %v1647_v31, %v2273_v51 }
 0x39c   : > { %1652 = vrcp.f32 %v874_v32  ;;  %v1651_v60 = vpop.eup %1650  ;;  %v871_v39 = vpop.xlane.xlu1 %870  ;;  %v940_v41 = vmul.f32 %v1649_v34, %v2251_v37  ;;  %v941_v59 = vmul.f32 %v1649_v34, %v2253_v38 }
 0x39d   : > { %1654 = vrcp.f32 %v871_v39  ;;  %v936_v12 = vmul.f32 %v1651_v60, %v2267_v47  ;;  %v937_v43 = vmul.f32 %v1651_v60, %v2269_v56  ;;  %v981_v47 = vld [vmem:[%s979_s0 + $0x10] sm:$0xff] }
 0x39e   : > { %v966_v63 = vpack.c.bf16 %v940_v41, %v938_v26  ;;  %v967_v23 = vpack.c.bf16 %v941_v59, %v939_v35  ;;  %v986_v55 = vpack.c.bf16 %v981_v47, %v980_v46 }
 0x39f   : > { %991 = vmatpush.bf16.msrb.mxu2 %v968_v57  ;;  %1005 = vmatpush.bf16.msrb.mxu3 %v969_v20 }
 0x3a2   : > { %v1653_v36 = vpop.eup %1652 }
 0x3a3   : > { %992 = vmatpush.bf16.msrb.mxu2 %v966_v63  ;;  %1006 = vmatpush.bf16.msrb.mxu3 %v967_v23  ;;  %v868_v16 = vpop.xlane.xlu2 %867  ;;  %v934_v51 = vmul.f32 %v1653_v36, %v2285_v11  ;;  %v935_v42 = vmul.f32 %v1653_v36, %v2287_v52  ;;  %v1655_v38 = vpop.eup %1654 }
 0x3a4   : > { %1656 = vrcp.f32 %v868_v16  ;;  %v932_v6 = vmul.f32 %v1655_v38, %v2281_v62  ;;  %v933_v52 = vmul.f32 %v1655_v38, %v2283_v5  ;;  %v984_v62 = vld [vmem:[#allocation4 + $0x18] sm:$0xff] }
 0x3a5   : > { %v964_v37 = vpack.c.bf16 %v936_v12, %v934_v51  ;;  %v965_v44 = vpack.c.bf16 %v937_v43, %v935_v42 }
 0x3a7   : > { %993 = vmatpush.bf16.msrb.mxu2 %v964_v37  ;;  %1007 = vmatpush.bf16.msrb.mxu3 %v965_v44 }
 0x3aa   : > { %v1657_v45 = vpop.eup %1656 }
 0x3ab   : > { %v930_v53 = vmul.f32 %v1657_v45, %v2293_v22  ;;  %v931_v11 = vmul.f32 %v1657_v45, %v2295_v3  ;;  %v985_v22 = vld [vmem:[#allocation4 + $0x8] sm:$0xff] }
 0x3ad   : > { %v962_v56 = vpack.c.bf16 %v932_v6, %v930_v53  ;;  %v963_v48 = vpack.c.bf16 %v933_v52, %v931_v11 }
 0x3af   : > { %994 = vmatpush.bf16.msrb.mxu2 %v962_v56  ;;  %1008 = vmatpush.bf16.msrb.mxu3 %v963_v48 }
 0x3b2   : > { %995 = vmatmul.bf16.vlgmr.msrb.gmra.mxu2 %v986_v55  ;;  %1009 = vmatmul.bf16.vlgmr.msrb.gmra.mxu3 %v986_v55 }
 0x435   : > { %v996_v25 = vpop.f32.mrf.mxu2  ;;  %v1010_v50 = vpop.f32.mrf.mxu3 }
 0x436   : > { %v1015_v19 = vadd.f32 %v996_v25, %v982_v58  ;;  %v1016_v13 = vadd.f32 %v1010_v50, %v983_v9 }
 0x438   : > { %1019 = vst [vmem:[#allocation4 + $0x10] sm:$0xff] %v1015_v19 }
 0x439   : > { %1020 = vst [vmem:[#allocation4] sm:$0xff] %v1016_v13 }
 0x43d   : > { %v998_v3 = vpop.f32.mrf.mxu2  ;;  %v1012_v49 = vpop.f32.mrf.mxu3  ;;  %1026 = sbr.rel (%p1439_p4) target bundleno = 1623 (0x657), region = 60 }
 0x43e   : > { %v1017_v5 = vadd.f32 %v998_v3, %v984_v62  ;;  %v1018_v17 = vadd.f32 %v1012_v49, %v985_v22 }
 0x440   : > { %1021 = vst [vmem:[#allocation4 + $0x18] sm:$0xff] %v1017_v5 }
 0x441   : > { %1022 = vst [vmem:[#allocation4 + $0x8] sm:$0xff] %v1018_v17 }
 0x442   : > { %v1035_v4 = vld [vmem:[#allocation3] sm:$0xff]  ;;  %v1036_v21 = vld [vmem:[#allocation3 + $0x8] sm:$0xff]  ;;  %v1037_v18 = vld [vmem:[#allocation3 + $0x10] sm:$0xff]  ;;  %v1041_v30 = vstv %s1027_s27  ;;  %v1187_v57 = vstv %s1441_s22  ;;  %v1048_v41 = vstv %s1440_s7  ;;  %v1194_v37 = vstv %s1442_s24 }
 0x443   : > { %1068 = vmatpush.xpose.msra.mxu0 %v1035_v4  ;;  %1088 = vmatpush.xpose.msra.mxu1 %v1036_v21  ;;  %v1038_v15 = vld [vmem:[#allocation3 + $0x18] sm:$0xff]  ;;  %v1039_v1 = vld [vmem:[#allocation4 + $0x10] sm:$0xff]  ;;  %v1040_v31 = vld [vmem:[#allocation4] sm:$0xff] }
 0x444   : > { %1122 = vmatpush.msra.mxu2 %v1035_v4  ;;  %1142 = vmatpush.msra.mxu3 %v1036_v21  ;;  %v1042_v32 = vmul.f32 %v1041_v30, %v1039_v1  ;;  %v1043_v33 = vmul.f32 %v1041_v30, %v1040_v31  ;;  %v1031_v14 = vld [vmem:[%s2020_s18] sm:$0xff]  ;;  %v1032_v34 = vld [vmem:[%s2020_s18 + $0x8] sm:$0xff] }
 0x445   : > { %v1033_v42 = vld [vmem:[%s2009_s9] sm:$0xff]  ;;  %v1034_v43 = vld [vmem:[%s2009_s9 + $0x8] sm:$0xff] }
 0x446   : > { %1162 = vmatpush.msrb.mxu2 %v1037_v18  ;;  %1182 = vmatpush.msrb.mxu3 %v1038_v15  ;;  %v1044_v20 = vadd.f32 %v1042_v32, %v1031_v14  ;;  %v1045_v26 = vadd.f32 %v1043_v33, %v1032_v34 }
 0x447   : > { %1069 = vmatmul.f32.vlgmr.msra.gmra.mxu0 %v1037_v18  ;;  %1089 = vmatmul.f32.vlgmr.msra.gmra.mxu1 %v1038_v15  ;;  %v1046_v39 = vld [vmem:[#allocation4 + $0x18] sm:$0xff] }
 0x448   : > { %v1047_v59 = vld [vmem:[#allocation4 + $0x8] sm:$0xff]  ;;  %v1049_v16 = vmul.f32 %v1048_v41, %v1046_v39 }
 0x449   : > { %v1050_v51 = vmul.f32 %v1048_v41, %v1047_v59 }
 0x44a   : > { %v1051_v44 = vadd.f32 %v1049_v16, %v1033_v42 }
 0x44b   : > { %v1052_v38 = vadd.f32 %v1050_v51, %v1034_v43 }
 0x4c4   : > { %v1070_v61 = vpop.f32.mrf.mxu0  ;;  %v1090_v27 = vpop.f32.mrf.mxu1 }
 0x4c5   : > { %v1091_v7 = vadd.f32 %v1090_v27, %v1070_v61 }
 0x4c7   : > { %v1093_v54 = vsel %vm543_vm1, %v1091_v7, inf }
 0x4c8   : > { %1094 = vmin.xlane.f32.xlu0 %v1093_v54 }
 0x53b   : > { %v1095_v2 = vpop.xlane.xlu0 %1094 }
 0x53c   : > { %v1096_v10 = vsub.f32 %v1095_v2, %v1091_v7 }
 0x53e   : > { %v1097_v40 = vmul.f32 1.442695, %v1096_v10 }
 0x540   : > { %1658 = vpow2.f32 %v1097_v40 }
 0x546   : > { %v1659_v8 = vpop.eup %1658 }
 0x547   : > { %v1099_v0 = vsel %vm543_vm1, %v1659_v8, 0.0 }
 0x548   : > { %1100 = vadd.xlane.f32.xlu0 %v1099_v0 }
 0x5bb   : > { %v1101_v29 = vpop.xlane.xlu0 %1100 }
 0x5bc   : > { %1660 = vrcp.f32 %v1101_v29 }
 0x5c2   : > { %v1661_v24 = vpop.eup %1660 }
 0x5c3   : > { %v1103_v28 = vmul.f32 %v1661_v24, %v1659_v8 }
 0x5c5   : > { %1443 = vmatmul.msk.f32.vlgmr.msra.gmra.mxu2 %vm543_vm1, %v1103_v28  ;;  %1444 = vmatmul.msk.f32.vlgmr.msra.gmra.mxu3 %vm543_vm1, %v1103_v28 }
 0x5cd   : > { %1445 = vmatmul.msk.f32.vlgmr.msrb.gmra.mxu2 %vm543_vm1, %v1103_v28  ;;  %1446 = vmatmul.msk.f32.vlgmr.msrb.gmra.mxu3 %vm543_vm1, %v1103_v28 }
 0x648   : > { %v1124_v35 = vpop.f32.mrf.mxu2  ;;  %v1144_v60 = vpop.f32.mrf.mxu3 }
 0x649   : > { %v1188_v63 = vmul.f32 %v1187_v57, %v1124_v35  ;;  %v1189_v23 = vmul.f32 %v1187_v57, %v1144_v60 }
 0x64b   : > { %v1190_v36 = vadd.f32 %v1188_v63, %v1044_v20  ;;  %v1191_v12 = vadd.f32 %v1189_v23, %v1045_v26 }
 0x64d   : > { %1192 = vst [vmem:[%s2022_s10] sm:$0xff] %v1190_v36 }
 0x64e   : > { %1193 = vst [vmem:[%s2022_s10 + $0x8] sm:$0xff] %v1191_v12 }
 0x650   : > { %v1164_v45 = vpop.f32.mrf.mxu2  ;;  %v1184_v46 = vpop.f32.mrf.mxu3 }
 0x651   : > { %v1195_v47 = vmul.f32 %v1194_v37, %v1164_v45  ;;  %v1196_v53 = vmul.f32 %v1194_v37, %v1184_v46 }
 0x653   : > { %v1197_v6 = vadd.f32 %v1195_v47, %v1051_v44  ;;  %v1198_v11 = vadd.f32 %v1196_v53, %v1052_v38 }
 0x655   : > { %1199 = vst [vmem:[%s2024_s15] sm:$0xff] %v1197_v6 }
 0x656   : > { %1200 = vst [vmem:[%s2024_s15 + $0x8] sm:$0xff] %v1198_v11 }
 0x657 PF: > { %s1457_s18 = sshll.u32 %s1829_s28, 4  ;;  %s1220_s13 = sshll.u32 %s2022_s10, 4  ;;  %s1221_s13 = int_to_ptr.vmem [resolvable:$true] %s1220_s13 }
 0x658   : > { %s1218_s11 = scalar_lea.hbm %s2413_s6, %s1457_s18  ;;  %s1202_s12 = scalar_lea.sflag [#allocation7], %s2005_s19 }
 0x659   : > { %s1222_s16 = sshll.u32 %s1218_s11, 4  ;;  %s1727_s28 = scalar_lea.hbm %s2413_s6, 32  ;;  %s1223_s16 = int_to_ptr.hbm [resolvable:$true] %s1222_s16 }
 0x65a   : > { %s1721_s17 = sshra.s32 %s1223_s16, 4  ;;  %s1722_s17 = int_to_ptr.hbm [resolvable:$true] %s1721_s17 }
 0x65b   : > { %s1723_s20 = scalar_lea.hbm %s1722_s17, 16  ;;  %p1728_p13 = scmp.lt.s32.totalorder %s1722_s17, %s2413_s6 }
 0x65c   : > { %p1724_p10 = scmp.ne.s32.totalorder %s1722_s17, %s1723_s20  ;;  %p1729_p3 = scmp.lt.s32.totalorder %s1727_s28, %s1723_s20 }
 0x65e   : > { %p1725_p11 = pnand %p1724_p10, %p1973_p0  ;;  %p1730_p5 = por %p1729_p3, %p1728_p13 }
 0x660   : > { %p1726_p12 = pneg %p1725_p11 }
 0x662   : > { %p1731_p7 = pnand %p1730_p5, %p1726_p12 }
 0x664   : > { %1734 = shalt.err (!%p1731_p7)
}
 0x665   : > { %1467 = dma.vmem_to_hbm [thread:$0]  (%p1973_p0), %s1221_s13, 256, %s1223_s16, %s1202_s12  }
 0x666   : > { %s2433_s9 = sld [smem:[#allocation22_spill]]  ;;  %s1235_s11 = sshll.u32 %s2024_s15, 4  ;;  %s1236_s11 = int_to_ptr.vmem [resolvable:$true] %s1235_s11 }
 0x667   : > { %s1207_s27 = scalar_lea.sflag [#allocation12], %s2005_s19 }
 0x66c   : > { %s1233_s29 = scalar_lea.hbm %s2433_s9, %s1457_s18  ;;  %s1755_s13 = scalar_lea.hbm %s2433_s9, 32 }
 0x66d   : > { %s1237_s0 = sshll.u32 %s1233_s29, 4  ;;  %s1238_s0 = int_to_ptr.hbm [resolvable:$true] %s1237_s0 }
 0x66e   : > { %s1749_s17 = sshra.s32 %s1238_s0, 4  ;;  %s1750_s17 = int_to_ptr.hbm [resolvable:$true] %s1749_s17 }
 0x66f   : > { %s1751_s20 = scalar_lea.hbm %s1750_s17, 16  ;;  %p1756_p1 = scmp.lt.s32.totalorder %s1750_s17, %s2433_s9 }
 0x670   : > { %p1752_p9 = scmp.ne.s32.totalorder %s1750_s17, %s1751_s20  ;;  %p1757_p4 = scmp.lt.s32.totalorder %s1755_s13, %s1751_s20 }
 0x672   : > { %p1753_p2 = pnand %p1752_p9, %p1973_p0  ;;  %p1758_p10 = por %p1757_p4, %p1756_p1 }
 0x674   : > { %p1754_p8 = pneg %p1753_p2 }
 0x676   : > { %p1759_p11 = pnand %p1758_p10, %p1754_p8 }
 0x678   : > { %1762 = shalt.err (!%p1759_p11)
}
 0x679   : > { %1468 = dma.vmem_to_hbm [thread:$0]  (%p1973_p0), %s1236_s11, 256, %s1238_s0, %s1207_s27  }
 0x67a PF: > { %s2434_s19 = sld [smem:[#allocation17_spill]]  ;;  %p1489_p12 = scmp.ge.s32.totalorder %s1841_s8, 2 }
 0x67c   : > { %p1480_p13 = pnand %p1489_p12, %p1946_p6 }
 0x67e   : > { %p1481_p3 = pneg %p1480_p13 }
 0x680   : > { %s1249_s18 = sand.u32 1, %s2434_s19  }
 0x681   : > { %s1250_s7 = scalar_lea.sflag [#allocation7], %s1249_s18 }
 0x682   : > { %1804 = dma.done.wait (%p1481_p3), %s1250_s7, 256  }
 0x683   : > { %1806 = vsyncadd (%p1481_p3), %s1250_s7, 4294967040  ;;  %s1260_s10 = scalar_lea.sflag [#allocation12], %s1249_s18 }
 0x684   : > { %1808 = dma.done.wait (%p1481_p3), %s1260_s10, 256  }
 0x685   : > { %1810 = vsyncadd (%p1481_p3), %s1260_s10, 4294967040  ;;  %s28_s8 = sadd.s32 1, %s1841_s8   ;;  %s2436_s27 = sld [smem:[#allocation18_spill]] }
 0x686   : > { %p25_p5 = scmp.ge.s32.totalorder %s28_s8, 6   ;;  %s2437_s29 = sld [smem:[#allocation20_spill]] }
 0x687   : > { %s2438_s24 = smov %s1817_s25  ;;  %s2439_s25 = smov %s1821_s26 }
 0x688   : > { %s2440_s26 = smov %s1992_s14  ;;  %s2441_s28 = smov %s1837_s30 }
 0x689   : > { %s2442_s30 = smov %s2448_s21  ;;  %27 = sbr.rel (!%p25_p5) target bundleno = 13 (0xd), region = 124 }
 0x68e   :  { %1266 = vsyncpa [#allocation6], 1 }
 0x68f   :  { %1268 = vsyncpa [#allocation6 + $0x1], 1 }
 0x690   :  { %1269 = vsyncpa [#allocation7], 1 }
 0x691   :  { %1271 = vsyncpa [#allocation7 + $0x1], 1 }
 0x692   :  { %1272 = vsyncpa [#allocation12], 1 }
 0x693   :  { %1274 = vsyncpa [#allocation12 + $0x1], 1 }
 0x694   :  { %1275 = vsyncpa [#allocation8], 1 }
 0x695   :  { %1277 = vsyncpa [#allocation8 + $0x1], 1 }

</bundles_post_ra>
